<compile_context>
chip_gen: v6e
topology: v6e:2x2x1
jax: 0.10.0
libtpu: 0.0.40
codegen_flags: <defaults>
</compile_context>

<pallas_src>
import numpy as np
import jax
import jax.numpy as jnp
from jax.experimental import pallas as pl
from jax.experimental.pallas import tpu as pltpu

LOG2 = float(np.log(2.0))


def _srl_kernel(esel_ref, ipack_ref, jpack_ref, acc_ref):
    # grid = (j, i); i is the inner, "arbitrary" accumulation axis (acc stays resident).
    @pl.when(pl.program_id(1) == 0)
    def _init():
        acc_ref[...] = jnp.zeros_like(acc_ref)

    # i-side pack: [output, strata, rank_i_eff]  -> (tm, 1) columns
    out_i = ipack_ref[:, 0:1]
    strat_i = ipack_ref[:, 1:2]
    rank_i = ipack_ref[:, 2:3]

    # j-side pack: [output, strata, rank_j]      -> (1, tn) rows
    out_j = jpack_ref[0:1, :]
    strat_j = jpack_ref[1:2, :]
    rank_j = jpack_ref[2:3, :]

    # Pair predicate (censoring + padding already folded into the rank sentinels).
    mask = (strat_i == strat_j) & (rank_i < rank_j)                       # (tm, tn) bool

    v = out_i - out_j                                                     # (tm, tn)
    # Numerically stable logsigmoid(v) = min(v, 0) - log1p(exp(-|v|)) (exp/log on EUP slot)
    logsig = jnp.minimum(v, 0.0) - jnp.log1p(jnp.exp(-jnp.abs(v)))
    contrib = jnp.where(mask, logsig, 0.0)                                # single vselect

    # tm -> 8 sublane reduction on the otherwise idle MXU:
    # esel[r, k] = 1.0 iff k % 8 == r, so esel @ contrib == reshape(tm//8, 8, tn).sum(0).
    acc_ref[...] += jnp.dot(esel_ref[...], contrib,
                            preferred_element_type=jnp.float32)


def _round_up(x, m):
    return ((x + m - 1) // m) * m


def _device_defaults():
    """Per-generation tile/VMEM defaults (conservative fallback for unknown chips)."""
    try:
        kind = jax.devices()[0].device_kind.lower()
    except Exception:
        kind = ""
    if ("v5" in kind) or ("v6" in kind):
        # Single TensorCore, 128 MiB physical VMEM: big lane tile, generous scoped limit.
        return dict(tm=512, tn=2048, vmem=64 * 1024 * 1024, split_j=False)
    # v7x (2 TCs, 64 MiB VMEM/TC) and unknown chips: smaller j-tile, tighter cap,
    # and force >=2 j-blocks so both TensorCores get work.
    return dict(tm=512, tn=1024, vmem=40 * 1024 * 1024, split_j=True)


def _balanced_tile(n, tile_max, align, min_blocks=1):
    """Smallest `align`-multiple tile giving max(ceil(n / tile_max), min_blocks) blocks."""
    nb = max(-(-n // max(tile_max, 1)), min_blocks, 1)
    t = -(-n // nb)
    t = max(_round_up(t, align), align)
    return t, nb


def stratified_ranking_loss(output, event_time, event_indicator, strata=None, *,
                            tm=None, tn=None, vmem_limit_bytes=None):
    output = jnp.asarray(output, jnp.float32)
    n = output.shape[0]
    event_time = jnp.asarray(event_time)                 # keep original dtype for the sort
    event_indicator = jnp.asarray(event_indicator)
    if strata is None:
        strata = jnp.ones((n,), jnp.int32)
    strata = jnp.asarray(strata)

    # ---- tile selection ------------------------------------------------------------
    dflt = _device_defaults()
    tm_max = dflt["tm"] if tm is None else int(tm)
    tn_max = dflt["tn"] if tn is None else int(tn)
    if vmem_limit_bytes is None:
        vmem_limit_bytes = dflt["vmem"]
    min_j_blocks = 2 if (dflt["split_j"] and n > 128) else 1
    tm, n_i = _balanced_tile(n, tm_max, 8)
    tn, n_j = _balanced_tile(n, tn_max, 128, min_blocks=min_j_blocks)
    n_pad_i, n_pad_j = n_i * tm, n_j * tn
    pad_i, pad_j = n_pad_i - n, n_pad_j - n

    # ---- O(n log n) JAX preprocessing ------------------------------------------------
    # Stable rank of event_time (ties broken by original index, like a stable argsort).
    order_t = jnp.argsort(event_time, stable=True)
    rank = jnp.zeros((n,), jnp.int32).at[order_t].set(jnp.arange(n, dtype=jnp.int32))
    uncensored = event_indicator != 0

    # Exact valid-pair count (denominator), computed analytically instead of in-kernel:
    # group items by strata while keeping the (stable) time order inside each group,
    # then for every uncensored item count the later items of its group.
    s_time = strata[order_t]
    perm_g = jnp.argsort(s_time, stable=True)
    final_order = order_t[perm_g]                 # grouped by strata, time-sorted inside
    s_g = s_time[perm_g]
    e_g = uncensored[final_order]
    pos = jnp.arange(n, dtype=jnp.int32)
    is_last = jnp.concatenate([s_g[1:] != s_g[:-1], jnp.array([True])])
    group_end = jnp.flip(jax.lax.cummin(jnp.flip(jnp.where(is_last, pos + 1, n))))
    # NOTE: int32 count is exact up to ~2.1e9 pairs (n ~ 65k in one stratum).
    valid_pairs_i = jnp.sum(jnp.where(e_g, group_end - pos - 1, 0))
    valid_pairs = valid_pairs_i.astype(jnp.float32)

    # Ranks / strata carried as f32 inside the kernel (exact for values < 2^24).
    big = float(n + 2)                            # > any real rank
    rank_i_eff = jnp.where(uncensored, rank, n + 2).astype(jnp.float32)
    rank_j = rank.astype(jnp.float32)
    strata_f = strata.astype(jnp.float32)

    # Independent padding of the i- and j-extents (no lcm blow-up).
    ipack = jnp.stack([jnp.pad(output, (0, pad_i)),
                       jnp.pad(strata_f, (0, pad_i)),
                       jnp.pad(rank_i_eff, (0, pad_i), constant_values=big)], axis=1)
    jpack = jnp.stack([jnp.pad(output, (0, pad_j)),
                       jnp.pad(strata_f, (0, pad_j)),
                       jnp.pad(rank_j, (0, pad_j), constant_values=-1.0)], axis=0)

    # Sublane-selector matrix for the MXU-side tm -> 8 reduction.
    esel = (jnp.arange(tm, dtype=jnp.int32)[None, :] % 8
            == jnp.arange(8, dtype=jnp.int32)[:, None]).astype(jnp.float32)   # (8, tm)

    area = n_pad_i * n_pad_j
    cost = pl.CostEstimate(
        flops=int(28 * area),                      # ~12 VALU-equiv + selector matmul
        transcendentals=int(2 * area),             # exp + log per pair
        bytes_accessed=int(4 * (n_j * ipack.size + jpack.size + esel.size + 8 * n_pad_j)),
    )

    acc = pl.pallas_call(
        _srl_kernel,
        out_shape=jax.ShapeDtypeStruct((8, n_pad_j), jnp.float32),
        grid_spec=pltpu.PrefetchScalarGridSpec(
            num_scalar_prefetch=0,
            grid=(n_j, n_i),                               # j outer (parallel), i inner
            in_specs=[pl.BlockSpec((8, tm), lambda j, i: (0, 0)),    # sublane selector
                      pl.BlockSpec((tm, 3), lambda j, i: (i, 0)),    # packed i-side
                      pl.BlockSpec((3, tn), lambda j, i: (0, j))],   # packed j-side
            out_specs=pl.BlockSpec((8, tn), lambda j, i: (0, j)),
        ),
        compiler_params=pltpu.CompilerParams(
            dimension_semantics=("parallel", "arbitrary"),
            vmem_limit_bytes=int(vmem_limit_bytes)),
        cost_estimate=cost,
    )(esel, ipack, jpack)

    # Reconstruct the reference loss from the masked-logsigmoid sum + exact pair count:
    #   loss = -(valid_pairs + sum(logsig)/log(2)) / valid_pairs
    # (f32 accumulation of sum(logsig); fine up to ~1e5 rows / ~1e10 pairs.)
    logsig_sum = jnp.sum(acc)
    ranking_sum = valid_pairs + logsig_sum * jnp.float32(1.0 / LOG2)
    return jnp.where(valid_pairs_i > 0,
                     -ranking_sum / jnp.maximum(valid_pairs, 1.0),
                     jnp.float32(jnp.nan))


def _reference_loss(output, event_time, event_indicator, strata):
    """Plain numpy re-implementation of the PyTorch module (stable sort for ties)."""
    out = np.asarray(output, np.float64)
    t = np.asarray(event_time)
    e = np.asarray(event_indicator, bool)
    s = np.asarray(strata)
    total_loss, total_pairs = 0.0, 0
    for g in np.unique(s):
        idx = np.where(s == g)[0]
        o, tt, ee = out[idx], t[idx], e[idx]
        order = np.argsort(tt, kind="stable")
        o, ee = o[order], ee[order]
        unc = np.where(ee)[0]
        if unc.size == 0:
            continue
        m = unc[:, None] < np.arange(len(o))
        vm = (o[unc, None] - o)[m]
        logsig = np.where(vm >= 0, -np.log1p(np.exp(-vm)), vm - np.log1p(np.exp(vm)))
        total_loss += -np.sum(1.0 + logsig / np.log(2.0))
        total_pairs += int(np.sum(len(o) - unc - 1))
    return total_loss / total_pairs


if __name__ == "__main__":
    key = jax.random.PRNGKey(0)

    def make_case(k, n, n_strata):
        k1, k2, k3, k4 = jax.random.split(k, 4)
        output = jax.random.normal(k1, (n,), dtype=jnp.float32)
        # Distinct integer event times (a permutation) so the sort order is unambiguous.
        event_time = jax.random.permutation(k2, jnp.arange(n, dtype=jnp.int32))
        event_indicator = (jax.random.uniform(k3, (n,)) < 0.6).astype(jnp.float32)
        event_indicator = event_indicator.at[0].set(1.0)   # at least one uncensored obs
        strata = jax.random.randint(k4, (n,), 0, n_strata, dtype=jnp.int32)
        return output, event_time, event_indicator, strata

    k_small, k_big = jax.random.split(key)

    # Small case (typical per-batch usage of the module), default device-aware tiles.
    out, t, e, s = make_case(k_small, 20, 3)
    loss = jax.block_until_ready(stratified_ranking_loss(out, t, e, s))
    ref = _reference_loss(np.asarray(out), np.asarray(t), np.asarray(e) > 0.5, np.asarray(s))
    assert np.isfinite(float(loss))
    assert np.allclose(float(loss), ref, rtol=1e-5, atol=1e-5), (float(loss), ref)

    # Larger case with explicit small tiles to exercise a multi-block grid
    # (several "arbitrary" i accumulation steps and several "parallel" j blocks).
    out, t, e, s = make_case(k_big, 300, 4)
    loss = jax.block_until_ready(stratified_ranking_loss(out, t, e, s, tm=64, tn=128))
    ref = _reference_loss(np.asarray(out), np.asarray(t), np.asarray(e) > 0.5, np.asarray(s))
    assert np.isfinite(float(loss))
    assert np.allclose(float(loss), ref, rtol=1e-4, atol=1e-5), (float(loss), ref)

    print("KERNEL_OK")
</pallas_src>

<mosaic_0001>
module attributes {stable_mosaic.version = 11 : i64} {
  func.func @_srl_kernel(%arg0: i32, %arg1: i32, %arg2: memref<8x24xf32, #tpu.memory_space<vmem>>, %arg3: memref<24x3xf32, #tpu.memory_space<vmem>>, %arg4: memref<3x128xf32, #tpu.memory_space<vmem>>, %arg5: memref<8x128xf32, #tpu.memory_space<vmem>>) attributes {dimension_semantics = [#tpu.dimension_semantics<parallel>, #tpu.dimension_semantics<arbitrary>], iteration_bounds = array<i64: 1, 1>, scalar_prefetch = 0 : i64, scratch_operands = 0 : i64, tpu.core_type = #tpu.core_type<tc>, window_params = [{pipeline_mode = #tpu.pipeline_mode<synchronous>, transform_indices = @transform_0, window_bounds = array<i64: 8, 24>}, {transform_indices = @transform_1, window_bounds = array<i64: 24, 3>}, {transform_indices = @transform_2, window_bounds = array<i64: 3, 128>}, {transform_indices = @transform_3, window_bounds = array<i64: 8, 128>}]} {
    %c0_i32 = arith.constant 0 : i32
    %0 = arith.cmpi eq, %arg1, %c0_i32 : i32
    %1 = arith.extui %0 : i1 to i32
    %c0_i32_0 = arith.constant 0 : i32
    %2 = arith.cmpi ne, %1, %c0_i32_0 : i32
    scf.if %2 {
      %cst_19 = arith.constant 0.000000e+00 : f32
      %34 = vector.broadcast %cst_19 : f32 to vector<8x128xf32>
      %c0_20 = arith.constant 0 : index
      %c0_21 = arith.constant 0 : index
      %35 = vector.load %arg5[%c0_20, %c0_21] : memref<8x128xf32, #tpu.memory_space<vmem>>, vector<8x128xf32>
      tpu.vector_store %arg5[%c0_20, %c0_21], %34 {strides = array<i32>} : memref<8x128xf32, #tpu.memory_space<vmem>>, vector<8x128xf32>,
    } else {
    }
    %c0 = arith.constant 0 : index
    %c0_1 = arith.constant 0 : index
    %3 = vector.load %arg3[%c0, %c0_1] : memref<24x3xf32, #tpu.memory_space<vmem>>, vector<24x1xf32>
    %c0_2 = arith.constant 0 : index
    %c1 = arith.constant 1 : index
    %4 = vector.load %arg3[%c0_2, %c1] : memref<24x3xf32, #tpu.memory_space<vmem>>, vector<24x1xf32>
    %c0_3 = arith.constant 0 : index
    %c2 = arith.constant 2 : index
    %5 = vector.load %arg3[%c0_3, %c2] : memref<24x3xf32, #tpu.memory_space<vmem>>, vector<24x1xf32>
    %c0_4 = arith.constant 0 : index
    %c0_5 = arith.constant 0 : index
    %6 = vector.load %arg4[%c0_4, %c0_5] : memref<3x128xf32, #tpu.memory_space<vmem>>, vector<1x128xf32>
    %c1_6 = arith.constant 1 : index
    %c0_7 = arith.constant 0 : index
    %7 = vector.load %arg4[%c1_6, %c0_7] : memref<3x128xf32, #tpu.memory_space<vmem>>, vector<1x128xf32>
    %c2_8 = arith.constant 2 : index
    %c0_9 = arith.constant 0 : index
    %8 = vector.load %arg4[%c2_8, %c0_9] : memref<3x128xf32, #tpu.memory_space<vmem>>, vector<1x128xf32>
    %9 = vector.broadcast %4 : vector<24x1xf32> to vector<24x128xf32>
    %10 = vector.broadcast %7 : vector<1x128xf32> to vector<24x128xf32>
    %11 = arith.cmpf oeq, %9, %10 : vector<24x128xf32>
    %12 = vector.broadcast %5 : vector<24x1xf32> to vector<24x128xf32>
    %13 = vector.broadcast %8 : vector<1x128xf32> to vector<24x128xf32>
    %14 = arith.cmpf olt, %12, %13 : vector<24x128xf32>
    %15 = arith.andi %11, %14 : vector<24x128xi1>
    %16 = vector.broadcast %3 : vector<24x1xf32> to vector<24x128xf32>
    %17 = vector.broadcast %6 : vector<1x128xf32> to vector<24x128xf32>
    %18 = arith.subf %16, %17 : vector<24x128xf32>
    %cst = arith.constant 0.000000e+00 : f32
    %19 = vector.broadcast %cst : f32 to vector<24x128xf32>
    %20 = arith.minimumf %18, %19 : vector<24x128xf32>
    %21 = math.absf %18 : vector<24x128xf32>
    %cst_10 = arith.constant 0.000000e+00 : f32
    %22 = vector.broadcast %cst_10 : f32 to vector<24x128xf32>
    %23 = arith.subf %22, %21 : vector<24x128xf32>
    %24 = math.exp %23 : vector<24x128xf32>
    %25 = math.log1p %24 : vector<24x128xf32>
    %26 = arith.subf %20, %25 : vector<24x128xf32>
    %cst_11 = arith.constant 0.000000e+00 : f32
    %27 = vector.broadcast %cst_11 : f32 to vector<24x128xf32>
    %28 = arith.select %15, %26, %27 : vector<24x128xi1>, vector<24x128xf32>
    %c0_12 = arith.constant 0 : index
    %c0_13 = arith.constant 0 : index
    %29 = vector.load %arg5[%c0_12, %c0_13] : memref<8x128xf32, #tpu.memory_space<vmem>>, vector<8x128xf32>
    %c0_14 = arith.constant 0 : index
    %c0_15 = arith.constant 0 : index
    %30 = vector.load %arg2[%c0_14, %c0_15] : memref<8x24xf32, #tpu.memory_space<vmem>>, vector<8x24xf32>
    %cst_16 = arith.constant dense<0.000000e+00> : vector<8x128xf32>
    %31 = tpu.matmul %30, %28, %cst_16 {dimension_numbers = #tpu.dot_dimension_numbers<[1], [0], [0], [1], [0, 0, 1, 1], [], []>} : vector<8x24xf32>, vector<24x128xf32>, vector<8x128xf32> -> vector<8x128xf32>
    %32 = arith.addf %29, %31 : vector<8x128xf32>
    %c0_17 = arith.constant 0 : index
    %c0_18 = arith.constant 0 : index
    %33 = vector.load %arg5[%c0_17, %c0_18] : memref<8x128xf32, #tpu.memory_space<vmem>>, vector<8x128xf32>
    tpu.vector_store %arg5[%c0_17, %c0_18], %32 {strides = array<i32>} : memref<8x128xf32, #tpu.memory_space<vmem>>, vector<8x128xf32>,
    return
  }
  func.func @transform_0(%arg0: i32, %arg1: i32) -> (i32, i32) {
    %c0_i32 = arith.constant 0 : i32
    %c0_i32_0 = arith.constant 0 : i32
    %c0_i32_1 = arith.constant 0 : i32
    return %c0_i32, %c0_i32_0 : i32, i32
  }
  func.func @transform_1(%arg0: i32, %arg1: i32) -> (i32, i32) {
    %c0_i32 = arith.constant 0 : i32
    %c0_i32_0 = arith.constant 0 : i32
    return %arg1, %c0_i32 : i32, i32
  }
  func.func @transform_2(%arg0: i32, %arg1: i32) -> (i32, i32) {
    %c0_i32 = arith.constant 0 : i32
    %c0_i32_0 = arith.constant 0 : i32
    return %c0_i32, %arg0 : i32, i32
  }
  func.func @transform_3(%arg0: i32, %arg1: i32) -> (i32, i32) {
    %c0_i32 = arith.constant 0 : i32
    %c0_i32_0 = arith.constant 0 : i32
    return %c0_i32, %arg0 : i32, i32
  }
}

</mosaic_0001>

<bundles_post_ra>
// kernel: tpu_custom_call.1
= control target key start
LH: loop header
LB: loop body
LE: loop exit
PB: predicated region body
PF: predicated region fallthrough
CT: control target
= control target key end

     0   :  { %v296_v2 = vmov 0   ;;  %s354_s0 = inlined_call_operand.vmem [shape: f32[8,24], index: 0, kind: input, shape index: {}]   ;;  %s355_s1 = inlined_call_operand.vmem [shape: f32[24,3], index: 1, kind: input, shape index: {}]   ;;  %s356_s2 = inlined_call_operand.vmem [shape: f32[3,128], index: 2, kind: input, shape index: {}]   ;;  %s357_s3 = inlined_call_operand.hbm [shape: f32[8,128], index: 3, kind: output, shape index: {}]  }
   0x1   :  { %v22_v0 = vld [vmem:[%s355_s1 + $0x10] sm:$0xff]  ;;  %v20_v1 = vld [vmem:[%s355_s1] sm:$0xff]  ;;  %256 = vset.pattern.permute.xlu1 %v296_v2  ;;  %255 = vset.pattern.permute.xlu0 %v296_v2 }
   0x2   :  { %8 = vsyncpa [#allocation3], 0  ;;  %79 = vperm.xlu0 %255, %v22_v0   ;;  %71 = vperm.xlu1 %256, %v20_v1   ;;  %v21_v3 = vld [vmem:[%s355_s1 + $0x8] sm:$0xff]  ;;  %v297_v4 = vmov 1   ;;  %v298_v5 = vmov 2   ;;  %v299_v6 = vmov 0.0  }
   0x3   :  { %240 = vmatprep.subr.mxu0 %v299_v6  ;;  %vm300_vm0 = vmmov 0   ;;  %v231_v7 = vld [vmem:[%s356_s2] ss:$0 sm:$0xff]  ;;  %v229_v35 = vld [vmem:[%s356_s2 + $0x1] ss:$0 sm:$0xff]  ;;  %vm139_vm12 = vcmask 195584  }
   0x4   :  { %246 = vmatprep.mubr.msk.f32.mxu0 %vm300_vm0, %v299_v6  ;;  %v230_v37 = vld [vmem:[%s356_s2 + $0x2] ss:$0 sm:$0xff]  ;;  %s301_s24 = smov [#allocation2]  }
   0x5   :  { %s221_s25 = sshll.u32 %s301_s24, 4  ;;  %s222_s25 = int_to_ptr.vmem [resolvable:$true] %s221_s25 }
   0x6   :  { %75 = vperm.xlu0 %255, %v21_v3   ;;  %257 = vset.pattern.permute.xlu1 %v297_v4  ;;  %s274_s26 = scalar_lea.vmem %s222_s25, 128  ;;  %p279_p1 = scmp.lt.s32.totalorder %s222_s25, %s222_s25 }
   0x7   :  { %38 = vperm.xlu1 %257, %v22_v0   ;;  %p275_p0 = scmp.ne.s32.totalorder %s222_s25, %s274_s26  ;;  %p280_p2 = scmp.lt.s32.totalorder %s274_s26, %s274_s26 }
   0x9   :  { %p281_p3 = por %p280_p2, %p279_p1 }
   0xa   :  { %258 = vset.pattern.permute.xlu0 %v298_v5 }
   0xb   :  { %33 = vperm.xlu1 %257, %v21_v3   ;;  %57 = vperm.xlu0 %258, %v22_v0   ;;  %v138_v0 = vld [vmem:[%s354_s0] sm:$0xff]  ;;  %p282_p4 = pnand %p281_p3, %p275_p0 }
   0xf   :  { %259 = vset.pattern.permute.xlu1 %v298_v5  ;;  %260 = vset.pattern.permute.xlu0 %v297_v4 }
  0x10   :  { %53 = vperm.xlu1 %259, %v21_v3   ;;  %28 = vperm.xlu0 %260, %v20_v1  }
  0x14   :  { %49 = vperm.xlu1 %259, %v20_v1   ;;  %261 = vset.pattern.permute.xlu0 %v296_v2 }
  0x7d   :  { %v80_v8 = vpop.permute.xlu0 %79  ;;  %v72_v9 = vpop.permute.xlu1 %71 }
  0x7e   :  { %v88_v10 = vsub.f32 %v80_v8, %v231_v7  ;;  %v336_v11 = vsub.f32 %v72_v9, %v231_v7 }
  0x80   :  { %v94_v12 = vand.u32 2147483647, %v88_v10  ;;  %v92_v13 = vand.u32 2147483647, %v336_v11  ;;  %v91_v41 = vmin.f32 %v88_v10, 0.0  ;;  %v89_v61 = vmin.f32 %v336_v11, 0.0 }
  0x81   :  { %v76_v14 = vpop.permute.xlu0 %75 }
  0x82   :  { %v97_v15 = vsub.f32 0.0, %v94_v12  ;;  %v95_v16 = vsub.f32 0.0, %v92_v13  ;;  %v87_v17 = vsub.f32 %v76_v14, %v231_v7  ;;  %v39_v29 = vpop.permute.xlu1 %38 }
  0x83   :  { %vm47_vm1 = vcmp.eq.f32.partialorder %v39_v29, %v229_v35 }
  0x84   :  { %v102_v18 = vmul.f32 1.442695, %v97_v15  ;;  %v98_v19 = vmul.f32 1.442695, %v95_v16  ;;  %v93_v20 = vand.u32 2147483647, %v87_v17 }
  0x85   :  { %v90_v54 = vmin.f32 %v87_v17, 0.0 }
  0x86   :  { %262 = vpow2.f32 %v102_v18  ;;  %v96_v21 = vsub.f32 0.0, %v93_v20  ;;  %v34_v31 = vpop.permute.xlu1 %33  ;;  %v58_v38 = vpop.permute.xlu0 %57 }
  0x87   :  { %264 = vpow2.f32 %v98_v19  ;;  %vm66_vm2 = vcmp.lt.f32.partialorder %v58_v38, %v230_v37  ;;  %vm46_vm7 = vcmp.eq.f32.partialorder %v34_v31, %v229_v35 }
  0x88   :  { %v100_v22 = vmul.f32 1.442695, %v96_v21  ;;  %vm69_vm4 = vmand %vm47_vm1, %vm66_vm2 }
  0x8a   :  { %266 = vpow2.f32 %v100_v22 }
  0x8b   :  { %v54_v46 = vpop.permute.xlu1 %53  ;;  %v29_v57 = vpop.permute.xlu0 %28 }
  0x8c   :  { %vm65_vm8 = vcmp.lt.f32.partialorder %v54_v46, %v230_v37  ;;  %vm45_vm9 = vcmp.eq.f32.partialorder %v29_v57, %v229_v35 }
  0x8d   :  { %vm68_vm11 = vmand %vm46_vm7, %vm65_vm8 }
  0x8f   :  { %v50_v58 = vpop.permute.xlu1 %49 }
  0x90   :  { %vm64_vm10 = vcmp.lt.f32.partialorder %v50_v58, %v230_v37 }
  0x91   :  { %vm67_vm13 = vmand %vm45_vm9, %vm64_vm10 }
  0x93   :  { %v263_v23 = vpop.eup %262 }
  0x94   :  { %v265_v24 = vpop.eup %264  ;;  %v122_v25 = vadd.f32 1.0, %v263_v23  ;;  %v125_v30 = vmul.f32 -0.5, %v263_v23  ;;  %v128_v36 = vand.u32 2147483647, %v263_v23 }
  0x95   :  { %v104_v26 = vadd.f32 1.0, %v265_v24  ;;  %v107_v33 = vmul.f32 -0.5, %v265_v24  ;;  %v110_v47 = vand.u32 2147483647, %v265_v24 }
  0x96   :  { %268 = vlog2.f32 %v122_v25  ;;  %v126_v32 = vadd.f32 1.0, %v125_v30  ;;  %vm129_vm3 = vcmp.lt.f32.partialorder %v128_v36, 0.0004427343 }
  0x97   :  { %270 = vlog2.f32 %v104_v26  ;;  %v267_v27 = vpop.eup %266  ;;  %v108_v44 = vadd.f32 1.0, %v107_v33  ;;  %vm111_vm5 = vcmp.lt.f32.partialorder %v110_v47, 0.0004427343 }
  0x98   :  { %v113_v28 = vadd.f32 1.0, %v267_v27  ;;  %v116_v34 = vmul.f32 -0.5, %v267_v27  ;;  %v127_v43 = vmul.f32 %v263_v23, %v126_v32  ;;  %v119_v48 = vand.u32 2147483647, %v267_v27 }
  0x99   :  { %v109_v53 = vmul.f32 %v265_v24, %v108_v44 }
  0x9a   :  { %272 = vlog2.f32 %v113_v28  ;;  %v117_v45 = vadd.f32 1.0, %v116_v34  ;;  %vm120_vm6 = vcmp.lt.f32.partialorder %v119_v48, 0.0004427343 }
  0x9c   :  { %v118_v56 = vmul.f32 %v267_v27, %v117_v45 }
  0xa3   :  { %v269_v39 = vpop.eup %268 }
  0xa4   :  { %v271_v40 = vpop.eup %270  ;;  %v124_v42 = vmul.f32 0.6931472, %v269_v39 }
  0xa5   :  { %v106_v50 = vmul.f32 0.6931472, %v271_v40 }
  0xa6   :  { %v130_v49 = vsel %vm129_vm3, %v127_v43, %v124_v42 }
  0xa7   :  { %v133_v51 = vsub.f32 %v91_v41, %v130_v49  ;;  %v273_v52 = vpop.eup %272  ;;  %v112_v59 = vsel %vm111_vm5, %v109_v53, %v106_v50 }
  0xa8   :  { %v115_v55 = vmul.f32 0.6931472, %v273_v52  ;;  %v131_v63 = vsub.f32 %v89_v61, %v112_v59 }
  0xa9   :  { %241 = vmatpush3.msk.msra.mxu0 %vm69_vm4, %v133_v51 }
  0xaa   :  { %242 = vmatprep.subr.mxu0 %v299_v6  ;;  %v121_v60 = vsel %vm120_vm6, %v118_v56, %v115_v55 }
  0xab   :  { %v132_v62 = vsub.f32 %v90_v54, %v121_v60 }
  0xad   :  { %243 = vmatpush3.msk.msra.mxu0 %vm68_vm11, %v132_v62 }
  0xae   :  { %244 = vmatprep.subr.mxu0 %v299_v6 }
  0xaf   :  { %245 = vmatpush3.msk.msra.mxu0 %vm67_vm13, %v131_v63 }
  0xb0   :  { %247 = vmatmul.mubr.msk.f32.vlgmr.msra.gmra.mxu0 %vm139_vm12, %v138_v0 }
 0x170   :  { %v209_v1 = vpop.f32.mrf.mxu0 }
 0x171   :  { %214 = vst [vmem:[#allocation2] sm:$0xff] %v209_v1 }
 0x172   :  { %v248_v2 = vpop.f32.mrf.mxu0 }
 0x173   :  { %285 = shalt.err (!%p282_p4)
}
 0x174   :  { %224 = dma.vmem_to_hbm [thread:$0]  %s222_s25, 128, %s357_s3, [#allocation3]  }
 0x175   :  { %294 = dma.done.wait [#allocation3], 128  }
 0x176   :  { %295 = vsyncadd [#allocation3], 4294967168 }
 0x177   :  { %228 = vsyncpa [#allocation3], 1 }

</bundles_post_ra>
